<compile_context>
chip_gen: v7x
topology: tpu7x:2x2x1
jax: 0.10.0
libtpu: 0.0.40
codegen_flags: <defaults>
</compile_context>

<pallas_src>
import functools

import jax
import jax.numpy as jnp
from jax import lax
from jax.experimental import pallas as pl
from jax.experimental.pallas import tpu as pltpu

_LANE = 128
_SUB = 8


def _metric_kernel(pred_ref, targ_ref, out_ref, acc_i, acc_p, acc_t, *,
                   num_classes, smooth, use_dice, pad_count):
    s = pl.program_id(1)
    ns = pl.num_programs(1)

    @pl.when(s == 0)
    def _():
        acc_i[...] = jnp.zeros_like(acc_i)
        acc_p[...] = jnp.zeros_like(acc_p)
        acc_t[...] = jnp.zeros_like(acc_t)

    p = pred_ref[...]        # (TN, C, S, 128), input dtype (compares stay native)
    t = targ_ref[...]        # (TN, C, S, 128)

    # Running strict-'>' argmax over the (small, outer) class axis.
    # Strict '>' preserves the first occurrence, matching torch.argmax.
    best_val = p[:, 0]                                   # (TN, S, 128)
    best_idx = jnp.zeros(best_val.shape, jnp.int32)
    for c in range(1, num_classes):
        pc = p[:, c]
        gt = pc > best_val
        best_val = jnp.where(gt, pc, best_val)
        best_idx = jnp.where(gt, jnp.int32(c), best_idx)

    # Per-class contributions: pure elementwise VALU adds into tile-shaped scratch.
    for c in range(num_classes):
        sel = best_idx == c                              # (TN, S, 128) bool
        tc = t[:, c].astype(jnp.float32)                 # (TN, S, 128)
        acc_i[c] = acc_i[c] + jnp.where(sel, tc, 0.0)    # intersection
        acc_p[c] = acc_p[c] + sel.astype(jnp.float32)    # prediction count
        acc_t[c] = acc_t[c] + tc                         # target count

    # Finalize: single deferred cross-lane/sublane reduce + nonlinear metric.
    @pl.when(s == ns - 1)
    def _():
        isum = jnp.sum(acc_i[...], axis=(2, 3))          # (C, TN)
        psum = jnp.sum(acc_p[...], axis=(2, 3))          # (C, TN)
        tsum = jnp.sum(acc_t[...], axis=(2, 3))          # (C, TN)
        if pad_count > 0:
            # Padded pixels (zero logits) argmax to class 0 and contribute only
            # to the prediction count; remove them here.
            cls = lax.broadcasted_iota(jnp.int32, psum.shape, 0)
            psum = psum - jnp.where(cls == 0, jnp.float32(pad_count), 0.0)
        inter = isum + smooth
        summ = psum + tsum + smooth
        if use_dice:
            m = 2.0 * inter / summ
        else:
            # union = summ - inter cancels `smooth`, exactly like the PyTorch
            # reference (0/0 for classes absent from both pred and target —
            # intentional parity with the spec).
            m = inter / (summ - inter)
        # Lane-dense, unmasked store of the per-batch-block partial sum.
        out_ref[...] = jnp.full(out_ref.shape, jnp.sum(m), jnp.float32)


def _largest_divisor_at_most(n, cap):
    cap = max(1, min(n, cap))
    for d in range(cap, 0, -1):
        if n % d == 0:
            return d
    return 1


def metric_pallas(predictions, targets, *, num_classes=3, smooth=1e-6,
                  use_dice=False, block_bytes=None):
    """predictions: (N, C, H, W) logits; targets: (N, C, H, W) one-hot masks.

    Inputs may be f32 / bf16 / int — upcast to f32 happens only for the
    accumulated (selected) values inside the kernel.
    """
    N, C, H, W = predictions.shape
    assert C == num_classes, "channel dim must equal num_classes"
    assert targets.shape == predictions.shape

    HW = H * W
    hw_pad = -(-HW // (_LANE * _SUB)) * (_LANE * _SUB)   # multiple of 8*128
    pad = hw_pad - HW

    p2 = predictions.reshape(N, C, HW)
    t2 = targets.reshape(N, C, HW)
    if pad:
        p2 = jnp.pad(p2, ((0, 0), (0, 0), (0, pad)))
        t2 = jnp.pad(t2, ((0, 0), (0, 0), (0, pad)))
    s_total = hw_pad // _LANE                            # multiple of 8
    p4 = p2.reshape(N, C, s_total, _LANE)
    t4 = t2.reshape(N, C, s_total, _LANE)

    # --- VMEM-aware sizing (75% of physical VMEM, conservative v7x fallback) ---
    vmem_cap = 64 * 1024 * 1024
    try:
        vmem_cap = int(pltpu.get_tpu_info().vmem_capacity_bytes)
    except Exception:
        pass
    vmem_limit = int(min(vmem_cap * 3 // 4, 96 * 1024 * 1024))
    if block_bytes is None:
        # Per-input block budget: 2 inputs x 2 pipeline buffers + 3 f32 tile-shaped
        # accumulators + compute temporaries must fit comfortably under the limit.
        block_bytes = int(max(512 * 1024, min(vmem_limit // 20, 4 * 1024 * 1024)))

    itemsize = max(jnp.dtype(p4.dtype).itemsize, jnp.dtype(t4.dtype).itemsize)
    row_bytes = C * hw_pad * itemsize                    # one batch row, one input

    if row_bytes <= block_bytes:
        s_tile = s_total
        max_tn = max(1, block_bytes // row_bytes)
        if N >= 2:
            # Keep at least 2 batch blocks so the "parallel" axis can shard
            # across v7x's two TensorCores.
            max_tn = min(max_tn, max(1, N // 2))
        tn = _largest_divisor_at_most(N, max_tn)
    else:
        tn = 1
        budget_groups = max(1, (block_bytes // (C * _LANE * itemsize)) // _SUB)
        g_tile = _largest_divisor_at_most(s_total // _SUB, budget_groups)
        s_tile = g_tile * _SUB                           # bounded, (8,128)-aligned

    nb = N // tn
    ns = s_total // s_tile
    grid = (nb, ns)

    kernel = functools.partial(
        _metric_kernel, num_classes=num_classes, smooth=float(smooth),
        use_dice=use_dice, pad_count=int(pad))

    out = pl.pallas_call(
        kernel,
        out_shape=jax.ShapeDtypeStruct((nb, _SUB, _LANE), jnp.float32),
        grid_spec=pltpu.PrefetchScalarGridSpec(
            num_scalar_prefetch=0,
            grid=grid,
            in_specs=[
                pl.BlockSpec((tn, C, s_tile, _LANE), lambda i, s: (i, 0, s, 0)),
                pl.BlockSpec((tn, C, s_tile, _LANE), lambda i, s: (i, 0, s, 0)),
            ],
            out_specs=pl.BlockSpec((1, _SUB, _LANE), lambda i, s: (i, 0, 0)),
            scratch_shapes=[pltpu.VMEM((C, tn, s_tile, _LANE), jnp.float32)] * 3,
        ),
        compiler_params=pltpu.CompilerParams(
            dimension_semantics=("parallel", "arbitrary"),
            vmem_limit_bytes=vmem_limit,
        ),
    )(p4, t4)

    # Tiny final reduction (one scalar per batch block) done in plain JAX.
    return out[:, 0, 0].sum() / jnp.float32(N * num_classes)


def metric_ref(predictions, targets, *, num_classes=3, smooth=1e-6,
               use_dice=False):
    """Pure-JAX reference mirroring the PyTorch module."""
    am = jnp.argmax(predictions, axis=1)                                   # (N,H,W)
    onehot = jax.nn.one_hot(am, num_classes, axis=1, dtype=jnp.float32)    # (N,C,H,W)
    t = targets.astype(jnp.float32)
    intersection = jnp.sum(onehot * t, axis=(2, 3)) + smooth
    summation = jnp.sum(onehot, axis=(2, 3)) + jnp.sum(t, axis=(2, 3)) + smooth
    if use_dice:
        m = 2.0 * intersection / summation
    else:
        m = intersection / (summation - intersection)
    return jnp.mean(m)


if __name__ == "__main__":
    num_classes = 3
    N, C, H, W = 2, num_classes, 16, 16

    key = jax.random.PRNGKey(0)
    k_pred, k_lbl = jax.random.split(key)

    # predictions: float logits over classes (NCHW)
    predictions = jax.random.normal(k_pred, (N, C, H, W), dtype=jnp.float32)
    # targets: one-hot ground-truth masks (NCHW), as the metric expects
    labels = jax.random.randint(k_lbl, (N, H, W), 0, num_classes)
    targets = jax.nn.one_hot(labels, num_classes, axis=1, dtype=jnp.float32)

    out_iou = metric_pallas(predictions, targets, num_classes=num_classes,
                            smooth=1e-6, use_dice=False)
    out_iou = jax.block_until_ready(out_iou)
    ref_iou = metric_ref(predictions, targets, num_classes=num_classes,
                         smooth=1e-6, use_dice=False)
    assert jnp.allclose(out_iou, ref_iou, rtol=1e-5, atol=1e-6), (out_iou, ref_iou)

    out_dice = metric_pallas(predictions, targets, num_classes=num_classes,
                             smooth=1e-6, use_dice=True)
    out_dice = jax.block_until_ready(out_dice)
    ref_dice = metric_ref(predictions, targets, num_classes=num_classes,
                          smooth=1e-6, use_dice=True)
    assert jnp.allclose(out_dice, ref_dice, rtol=1e-5, atol=1e-6), (out_dice, ref_dice)

    print("KERNEL_OK")
</pallas_src>

<mosaic_0001>
module attributes {stable_mosaic.version = 11 : i64} {
  func.func @_metric_kernel(%arg0: i32, %arg1: i32, %arg2: memref<1x3x8x128xf32, #tpu.memory_space<vmem>>, %arg3: memref<1x3x8x128xf32, #tpu.memory_space<vmem>>, %arg4: memref<1x8x128xf32, #tpu.memory_space<vmem>>, %arg5: memref<3x1x8x128xf32, #tpu.memory_space<vmem>>, %arg6: memref<3x1x8x128xf32, #tpu.memory_space<vmem>>, %arg7: memref<3x1x8x128xf32, #tpu.memory_space<vmem>>) attributes {dimension_semantics = [#tpu.dimension_semantics<parallel>, #tpu.dimension_semantics<arbitrary>], iteration_bounds = array<i64: 2, 1>, scalar_prefetch = 0 : i64, scratch_operands = 3 : i64, tpu.core_type = #tpu.core_type<tc>, window_params = [{transform_indices = @transform_0, window_bounds = array<i64: 1, 3, 8, 128>}, {transform_indices = @transform_1, window_bounds = array<i64: 1, 3, 8, 128>}, {transform_indices = @transform_2, window_bounds = array<i64: 1, 8, 128>}]} {
    %c0_i32 = arith.constant 0 : i32
    %0 = arith.cmpi eq, %arg1, %c0_i32 : i32
    %1 = arith.extui %0 : i1 to i32
    %c0_i32_0 = arith.constant 0 : i32
    %2 = arith.cmpi ne, %1, %c0_i32_0 : i32
    scf.if %2 {
      %cst_86 = arith.constant 0.000000e+00 : f32
      %100 = vector.broadcast %cst_86 : f32 to vector<3x1x8x128xf32>
      %c0_87 = arith.constant 0 : index
      %c0_88 = arith.constant 0 : index
      %c0_89 = arith.constant 0 : index
      %c0_90 = arith.constant 0 : index
      %101 = vector.load %arg5[%c0_87, %c0_88, %c0_89, %c0_90] : memref<3x1x8x128xf32, #tpu.memory_space<vmem>>, vector<3x1x8x128xf32>
      tpu.vector_store %arg5[%c0_87, %c0_88, %c0_89, %c0_90], %100 {strides = array<i32>} : memref<3x1x8x128xf32, #tpu.memory_space<vmem>>, vector<3x1x8x128xf32>,
      %cst_91 = arith.constant 0.000000e+00 : f32
      %102 = vector.broadcast %cst_91 : f32 to vector<3x1x8x128xf32>
      %c0_92 = arith.constant 0 : index
      %c0_93 = arith.constant 0 : index
      %c0_94 = arith.constant 0 : index
      %c0_95 = arith.constant 0 : index
      %103 = vector.load %arg6[%c0_92, %c0_93, %c0_94, %c0_95] : memref<3x1x8x128xf32, #tpu.memory_space<vmem>>, vector<3x1x8x128xf32>
      tpu.vector_store %arg6[%c0_92, %c0_93, %c0_94, %c0_95], %102 {strides = array<i32>} : memref<3x1x8x128xf32, #tpu.memory_space<vmem>>, vector<3x1x8x128xf32>,
      %cst_96 = arith.constant 0.000000e+00 : f32
      %104 = vector.broadcast %cst_96 : f32 to vector<3x1x8x128xf32>
      %c0_97 = arith.constant 0 : index
      %c0_98 = arith.constant 0 : index
      %c0_99 = arith.constant 0 : index
      %c0_100 = arith.constant 0 : index
      %105 = vector.load %arg7[%c0_97, %c0_98, %c0_99, %c0_100] : memref<3x1x8x128xf32, #tpu.memory_space<vmem>>, vector<3x1x8x128xf32>
      tpu.vector_store %arg7[%c0_97, %c0_98, %c0_99, %c0_100], %104 {strides = array<i32>} : memref<3x1x8x128xf32, #tpu.memory_space<vmem>>, vector<3x1x8x128xf32>,
    } else {
    }
    %c0 = arith.constant 0 : index
    %c0_1 = arith.constant 0 : index
    %c0_2 = arith.constant 0 : index
    %c0_3 = arith.constant 0 : index
    %3 = vector.load %arg2[%c0, %c0_1, %c0_2, %c0_3] : memref<1x3x8x128xf32, #tpu.memory_space<vmem>>, vector<1x3x8x128xf32>
    %c0_4 = arith.constant 0 : index
    %c0_5 = arith.constant 0 : index
    %c0_6 = arith.constant 0 : index
    %c0_7 = arith.constant 0 : index
    %4 = vector.load %arg3[%c0_4, %c0_5, %c0_6, %c0_7] : memref<1x3x8x128xf32, #tpu.memory_space<vmem>>, vector<1x3x8x128xf32>
    %5 = vector.extract_strided_slice %3 {offsets = [0, 0, 0, 0], sizes = [1, 1, 8, 128], strides = [1, 1, 1, 1]} : vector<1x3x8x128xf32> to vector<1x1x8x128xf32>
    %6 = vector.shape_cast %5 : vector<1x1x8x128xf32> to vector<1x8x128xf32>
    %c0_i32_8 = arith.constant 0 : i32
    %7 = vector.broadcast %c0_i32_8 : i32 to vector<1x8x128xi32>
    %8 = vector.extract_strided_slice %3 {offsets = [0, 1, 0, 0], sizes = [1, 1, 8, 128], strides = [1, 1, 1, 1]} : vector<1x3x8x128xf32> to vector<1x1x8x128xf32>
    %9 = vector.shape_cast %8 : vector<1x1x8x128xf32> to vector<1x8x128xf32>
    %10 = arith.cmpf ogt, %9, %6 : vector<1x8x128xf32>
    %11 = arith.select %10, %9, %6 : vector<1x8x128xi1>, vector<1x8x128xf32>
    %c1_i32 = arith.constant 1 : i32
    %12 = vector.broadcast %c1_i32 : i32 to vector<1x8x128xi32>
    %13 = arith.select %10, %12, %7 : vector<1x8x128xi1>, vector<1x8x128xi32>
    %14 = vector.extract_strided_slice %3 {offsets = [0, 2, 0, 0], sizes = [1, 1, 8, 128], strides = [1, 1, 1, 1]} : vector<1x3x8x128xf32> to vector<1x1x8x128xf32>
    %15 = vector.shape_cast %14 : vector<1x1x8x128xf32> to vector<1x8x128xf32>
    %16 = arith.cmpf ogt, %15, %11 : vector<1x8x128xf32>
    %c2_i32 = arith.constant 2 : i32
    %17 = vector.broadcast %c2_i32 : i32 to vector<1x8x128xi32>
    %18 = arith.select %16, %17, %13 : vector<1x8x128xi1>, vector<1x8x128xi32>
    %c0_i32_9 = arith.constant 0 : i32
    %19 = vector.broadcast %c0_i32_9 : i32 to vector<1x8x128xi32>
    %20 = arith.cmpi eq, %18, %19 : vector<1x8x128xi32>
    %21 = vector.extract_strided_slice %4 {offsets = [0, 0, 0, 0], sizes = [1, 1, 8, 128], strides = [1, 1, 1, 1]} : vector<1x3x8x128xf32> to vector<1x1x8x128xf32>
    %22 = vector.shape_cast %21 : vector<1x1x8x128xf32> to vector<1x8x128xf32>
    %c0_10 = arith.constant 0 : index
    %c0_11 = arith.constant 0 : index
    %c0_12 = arith.constant 0 : index
    %c0_13 = arith.constant 0 : index
    %23 = vector.load %arg5[%c0_10, %c0_11, %c0_12, %c0_13] : memref<3x1x8x128xf32, #tpu.memory_space<vmem>>, vector<1x1x8x128xf32>
    %24 = vector.shape_cast %23 : vector<1x1x8x128xf32> to vector<1x8x128xf32>
    %cst = arith.constant 0.000000e+00 : f32
    %25 = vector.broadcast %cst : f32 to vector<1x8x128xf32>
    %26 = arith.select %20, %22, %25 : vector<1x8x128xi1>, vector<1x8x128xf32>
    %27 = arith.addf %24, %26 : vector<1x8x128xf32>
    %c0_14 = arith.constant 0 : index
    %c0_15 = arith.constant 0 : index
    %c0_16 = arith.constant 0 : index
    %c0_17 = arith.constant 0 : index
    %28 = vector.load %arg5[%c0_14, %c0_15, %c0_16, %c0_17] : memref<3x1x8x128xf32, #tpu.memory_space<vmem>>, vector<1x1x8x128xf32>
    %29 = vector.shape_cast %28 : vector<1x1x8x128xf32> to vector<1x8x128xf32>
    %30 = vector.shape_cast %27 : vector<1x8x128xf32> to vector<1x1x8x128xf32>
    tpu.vector_store %arg5[%c0_14, %c0_15, %c0_16, %c0_17], %30 {strides = array<i32>} : memref<3x1x8x128xf32, #tpu.memory_space<vmem>>, vector<1x1x8x128xf32>,
    %c0_18 = arith.constant 0 : index
    %c0_19 = arith.constant 0 : index
    %c0_20 = arith.constant 0 : index
    %c0_21 = arith.constant 0 : index
    %31 = vector.load %arg6[%c0_18, %c0_19, %c0_20, %c0_21] : memref<3x1x8x128xf32, #tpu.memory_space<vmem>>, vector<1x1x8x128xf32>
    %32 = vector.shape_cast %31 : vector<1x1x8x128xf32> to vector<1x8x128xf32>
    %33 = arith.extui %20 : vector<1x8x128xi1> to vector<1x8x128xi32>
    %34 = arith.sitofp %33 : vector<1x8x128xi32> to vector<1x8x128xf32>
    %35 = arith.addf %32, %34 : vector<1x8x128xf32>
    %c0_22 = arith.constant 0 : index
    %c0_23 = arith.constant 0 : index
    %c0_24 = arith.constant 0 : index
    %c0_25 = arith.constant 0 : index
    %36 = vector.load %arg6[%c0_22, %c0_23, %c0_24, %c0_25] : memref<3x1x8x128xf32, #tpu.memory_space<vmem>>, vector<1x1x8x128xf32>
    %37 = vector.shape_cast %36 : vector<1x1x8x128xf32> to vector<1x8x128xf32>
    %38 = vector.shape_cast %35 : vector<1x8x128xf32> to vector<1x1x8x128xf32>
    tpu.vector_store %arg6[%c0_22, %c0_23, %c0_24, %c0_25], %38 {strides = array<i32>} : memref<3x1x8x128xf32, #tpu.memory_space<vmem>>, vector<1x1x8x128xf32>,
    %c0_26 = arith.constant 0 : index
    %c0_27 = arith.constant 0 : index
    %c0_28 = arith.constant 0 : index
    %c0_29 = arith.constant 0 : index
    %39 = vector.load %arg7[%c0_26, %c0_27, %c0_28, %c0_29] : memref<3x1x8x128xf32, #tpu.memory_space<vmem>>, vector<1x1x8x128xf32>
    %40 = vector.shape_cast %39 : vector<1x1x8x128xf32> to vector<1x8x128xf32>
    %41 = arith.addf %40, %22 : vector<1x8x128xf32>
    %c0_30 = arith.constant 0 : index
    %c0_31 = arith.constant 0 : index
    %c0_32 = arith.constant 0 : index
    %c0_33 = arith.constant 0 : index
    %42 = vector.load %arg7[%c0_30, %c0_31, %c0_32, %c0_33] : memref<3x1x8x128xf32, #tpu.memory_space<vmem>>, vector<1x1x8x128xf32>
    %43 = vector.shape_cast %42 : vector<1x1x8x128xf32> to vector<1x8x128xf32>
    %44 = vector.shape_cast %41 : vector<1x8x128xf32> to vector<1x1x8x128xf32>
    tpu.vector_store %arg7[%c0_30, %c0_31, %c0_32, %c0_33], %44 {strides = array<i32>} : memref<3x1x8x128xf32, #tpu.memory_space<vmem>>, vector<1x1x8x128xf32>,
    %c1_i32_34 = arith.constant 1 : i32
    %45 = vector.broadcast %c1_i32_34 : i32 to vector<1x8x128xi32>
    %46 = arith.cmpi eq, %18, %45 : vector<1x8x128xi32>
    %47 = vector.extract_strided_slice %4 {offsets = [0, 1, 0, 0], sizes = [1, 1, 8, 128], strides = [1, 1, 1, 1]} : vector<1x3x8x128xf32> to vector<1x1x8x128xf32>
    %48 = vector.shape_cast %47 : vector<1x1x8x128xf32> to vector<1x8x128xf32>
    %c1 = arith.constant 1 : index
    %c0_35 = arith.constant 0 : index
    %c0_36 = arith.constant 0 : index
    %c0_37 = arith.constant 0 : index
    %49 = vector.load %arg5[%c1, %c0_35, %c0_36, %c0_37] : memref<3x1x8x128xf32, #tpu.memory_space<vmem>>, vector<1x1x8x128xf32>
    %50 = vector.shape_cast %49 : vector<1x1x8x128xf32> to vector<1x8x128xf32>
    %cst_38 = arith.constant 0.000000e+00 : f32
    %51 = vector.broadcast %cst_38 : f32 to vector<1x8x128xf32>
    %52 = arith.select %46, %48, %51 : vector<1x8x128xi1>, vector<1x8x128xf32>
    %53 = arith.addf %50, %52 : vector<1x8x128xf32>
    %c1_39 = arith.constant 1 : index
    %c0_40 = arith.constant 0 : index
    %c0_41 = arith.constant 0 : index
    %c0_42 = arith.constant 0 : index
    %54 = vector.load %arg5[%c1_39, %c0_40, %c0_41, %c0_42] : memref<3x1x8x128xf32, #tpu.memory_space<vmem>>, vector<1x1x8x128xf32>
    %55 = vector.shape_cast %54 : vector<1x1x8x128xf32> to vector<1x8x128xf32>
    %56 = vector.shape_cast %53 : vector<1x8x128xf32> to vector<1x1x8x128xf32>
    tpu.vector_store %arg5[%c1_39, %c0_40, %c0_41, %c0_42], %56 {strides = array<i32>} : memref<3x1x8x128xf32, #tpu.memory_space<vmem>>, vector<1x1x8x128xf32>,
    %c1_43 = arith.constant 1 : index
    %c0_44 = arith.constant 0 : index
    %c0_45 = arith.constant 0 : index
    %c0_46 = arith.constant 0 : index
    %57 = vector.load %arg6[%c1_43, %c0_44, %c0_45, %c0_46] : memref<3x1x8x128xf32, #tpu.memory_space<vmem>>, vector<1x1x8x128xf32>
    %58 = vector.shape_cast %57 : vector<1x1x8x128xf32> to vector<1x8x128xf32>
    %59 = arith.extui %46 : vector<1x8x128xi1> to vector<1x8x128xi32>
    %60 = arith.sitofp %59 : vector<1x8x128xi32> to vector<1x8x128xf32>
    %61 = arith.addf %58, %60 : vector<1x8x128xf32>
    %c1_47 = arith.constant 1 : index
    %c0_48 = arith.constant 0 : index
    %c0_49 = arith.constant 0 : index
    %c0_50 = arith.constant 0 : index
    %62 = vector.load %arg6[%c1_47, %c0_48, %c0_49, %c0_50] : memref<3x1x8x128xf32, #tpu.memory_space<vmem>>, vector<1x1x8x128xf32>
    %63 = vector.shape_cast %62 : vector<1x1x8x128xf32> to vector<1x8x128xf32>
    %64 = vector.shape_cast %61 : vector<1x8x128xf32> to vector<1x1x8x128xf32>
    tpu.vector_store %arg6[%c1_47, %c0_48, %c0_49, %c0_50], %64 {strides = array<i32>} : memref<3x1x8x128xf32, #tpu.memory_space<vmem>>, vector<1x1x8x128xf32>,
    %c1_51 = arith.constant 1 : index
    %c0_52 = arith.constant 0 : index
    %c0_53 = arith.constant 0 : index
    %c0_54 = arith.constant 0 : index
    %65 = vector.load %arg7[%c1_51, %c0_52, %c0_53, %c0_54] : memref<3x1x8x128xf32, #tpu.memory_space<vmem>>, vector<1x1x8x128xf32>
    %66 = vector.shape_cast %65 : vector<1x1x8x128xf32> to vector<1x8x128xf32>
    %67 = arith.addf %66, %48 : vector<1x8x128xf32>
    %c1_55 = arith.constant 1 : index
    %c0_56 = arith.constant 0 : index
    %c0_57 = arith.constant 0 : index
    %c0_58 = arith.constant 0 : index
    %68 = vector.load %arg7[%c1_55, %c0_56, %c0_57, %c0_58] : memref<3x1x8x128xf32, #tpu.memory_space<vmem>>, vector<1x1x8x128xf32>
    %69 = vector.shape_cast %68 : vector<1x1x8x128xf32> to vector<1x8x128xf32>
    %70 = vector.shape_cast %67 : vector<1x8x128xf32> to vector<1x1x8x128xf32>
    tpu.vector_store %arg7[%c1_55, %c0_56, %c0_57, %c0_58], %70 {strides = array<i32>} : memref<3x1x8x128xf32, #tpu.memory_space<vmem>>, vector<1x1x8x128xf32>,
    %c2_i32_59 = arith.constant 2 : i32
    %71 = vector.broadcast %c2_i32_59 : i32 to vector<1x8x128xi32>
    %72 = arith.cmpi eq, %18, %71 : vector<1x8x128xi32>
    %73 = vector.extract_strided_slice %4 {offsets = [0, 2, 0, 0], sizes = [1, 1, 8, 128], strides = [1, 1, 1, 1]} : vector<1x3x8x128xf32> to vector<1x1x8x128xf32>
    %74 = vector.shape_cast %73 : vector<1x1x8x128xf32> to vector<1x8x128xf32>
    %c2 = arith.constant 2 : index
    %c0_60 = arith.constant 0 : index
    %c0_61 = arith.constant 0 : index
    %c0_62 = arith.constant 0 : index
    %75 = vector.load %arg5[%c2, %c0_60, %c0_61, %c0_62] : memref<3x1x8x128xf32, #tpu.memory_space<vmem>>, vector<1x1x8x128xf32>
    %76 = vector.shape_cast %75 : vector<1x1x8x128xf32> to vector<1x8x128xf32>
    %cst_63 = arith.constant 0.000000e+00 : f32
    %77 = vector.broadcast %cst_63 : f32 to vector<1x8x128xf32>
    %78 = arith.select %72, %74, %77 : vector<1x8x128xi1>, vector<1x8x128xf32>
    %79 = arith.addf %76, %78 : vector<1x8x128xf32>
    %c2_64 = arith.constant 2 : index
    %c0_65 = arith.constant 0 : index
    %c0_66 = arith.constant 0 : index
    %c0_67 = arith.constant 0 : index
    %80 = vector.load %arg5[%c2_64, %c0_65, %c0_66, %c0_67] : memref<3x1x8x128xf32, #tpu.memory_space<vmem>>, vector<1x1x8x128xf32>
    %81 = vector.shape_cast %80 : vector<1x1x8x128xf32> to vector<1x8x128xf32>
    %82 = vector.shape_cast %79 : vector<1x8x128xf32> to vector<1x1x8x128xf32>
    tpu.vector_store %arg5[%c2_64, %c0_65, %c0_66, %c0_67], %82 {strides = array<i32>} : memref<3x1x8x128xf32, #tpu.memory_space<vmem>>, vector<1x1x8x128xf32>,
    %c2_68 = arith.constant 2 : index
    %c0_69 = arith.constant 0 : index
    %c0_70 = arith.constant 0 : index
    %c0_71 = arith.constant 0 : index
    %83 = vector.load %arg6[%c2_68, %c0_69, %c0_70, %c0_71] : memref<3x1x8x128xf32, #tpu.memory_space<vmem>>, vector<1x1x8x128xf32>
    %84 = vector.shape_cast %83 : vector<1x1x8x128xf32> to vector<1x8x128xf32>
    %85 = arith.extui %72 : vector<1x8x128xi1> to vector<1x8x128xi32>
    %86 = arith.sitofp %85 : vector<1x8x128xi32> to vector<1x8x128xf32>
    %87 = arith.addf %84, %86 : vector<1x8x128xf32>
    %c2_72 = arith.constant 2 : index
    %c0_73 = arith.constant 0 : index
    %c0_74 = arith.constant 0 : index
    %c0_75 = arith.constant 0 : index
    %88 = vector.load %arg6[%c2_72, %c0_73, %c0_74, %c0_75] : memref<3x1x8x128xf32, #tpu.memory_space<vmem>>, vector<1x1x8x128xf32>
    %89 = vector.shape_cast %88 : vector<1x1x8x128xf32> to vector<1x8x128xf32>
    %90 = vector.shape_cast %87 : vector<1x8x128xf32> to vector<1x1x8x128xf32>
    tpu.vector_store %arg6[%c2_72, %c0_73, %c0_74, %c0_75], %90 {strides = array<i32>} : memref<3x1x8x128xf32, #tpu.memory_space<vmem>>, vector<1x1x8x128xf32>,
    %c2_76 = arith.constant 2 : index
    %c0_77 = arith.constant 0 : index
    %c0_78 = arith.constant 0 : index
    %c0_79 = arith.constant 0 : index
    %91 = vector.load %arg7[%c2_76, %c0_77, %c0_78, %c0_79] : memref<3x1x8x128xf32, #tpu.memory_space<vmem>>, vector<1x1x8x128xf32>
    %92 = vector.shape_cast %91 : vector<1x1x8x128xf32> to vector<1x8x128xf32>
    %93 = arith.addf %92, %74 : vector<1x8x128xf32>
    %c2_80 = arith.constant 2 : index
    %c0_81 = arith.constant 0 : index
    %c0_82 = arith.constant 0 : index
    %c0_83 = arith.constant 0 : index
    %94 = vector.load %arg7[%c2_80, %c0_81, %c0_82, %c0_83] : memref<3x1x8x128xf32, #tpu.memory_space<vmem>>, vector<1x1x8x128xf32>
    %95 = vector.shape_cast %94 : vector<1x1x8x128xf32> to vector<1x8x128xf32>
    %96 = vector.shape_cast %93 : vector<1x8x128xf32> to vector<1x1x8x128xf32>
    tpu.vector_store %arg7[%c2_80, %c0_81, %c0_82, %c0_83], %96 {strides = array<i32>} : memref<3x1x8x128xf32, #tpu.memory_space<vmem>>, vector<1x1x8x128xf32>,
    %c0_i32_84 = arith.constant 0 : i32
    %97 = arith.cmpi eq, %arg1, %c0_i32_84 : i32
    %98 = arith.extui %97 : i1 to i32
    %c0_i32_85 = arith.constant 0 : i32
    %99 = arith.cmpi ne, %98, %c0_i32_85 : i32
    scf.if %99 {
      %c0_86 = arith.constant 0 : index
      %c0_87 = arith.constant 0 : index
      %c0_88 = arith.constant 0 : index
      %c0_89 = arith.constant 0 : index
      %100 = vector.load %arg5[%c0_86, %c0_87, %c0_88, %c0_89] : memref<3x1x8x128xf32, #tpu.memory_space<vmem>>, vector<3x1x8x128xf32>
      %cst_90 = arith.constant dense<0.000000e+00> : vector<3x1xf32>
      %101 = vector.multi_reduction <add>, %100, %cst_90 [2, 3] : vector<3x1x8x128xf32> to vector<3x1xf32>
      %c0_91 = arith.constant 0 : index
      %c0_92 = arith.constant 0 : index
      %c0_93 = arith.constant 0 : index
      %c0_94 = arith.constant 0 : index
      %102 = vector.load %arg6[%c0_91, %c0_92, %c0_93, %c0_94] : memref<3x1x8x128xf32, #tpu.memory_space<vmem>>, vector<3x1x8x128xf32>
      %cst_95 = arith.constant dense<0.000000e+00> : vector<3x1xf32>
      %103 = vector.multi_reduction <add>, %102, %cst_95 [2, 3] : vector<3x1x8x128xf32> to vector<3x1xf32>
      %c0_96 = arith.constant 0 : index
      %c0_97 = arith.constant 0 : index
      %c0_98 = arith.constant 0 : index
      %c0_99 = arith.constant 0 : index
      %104 = vector.load %arg7[%c0_96, %c0_97, %c0_98, %c0_99] : memref<3x1x8x128xf32, #tpu.memory_space<vmem>>, vector<3x1x8x128xf32>
      %cst_100 = arith.constant dense<0.000000e+00> : vector<3x1xf32>
      %105 = vector.multi_reduction <add>, %104, %cst_100 [2, 3] : vector<3x1x8x128xf32> to vector<3x1xf32>
      %106 = tpu.iota {dimensions = array<i32: 0>} : vector<3x1xi32>
      %c0_i32_101 = arith.constant 0 : i32
      %107 = vector.broadcast %c0_i32_101 : i32 to vector<3x1xi32>
      %108 = arith.cmpi eq, %106, %107 : vector<3x1xi32>
      %cst_102 = arith.constant 7.680000e+02 : f32
      %cst_103 = arith.constant 0.000000e+00 : f32
      %109 = vector.broadcast %cst_102 : f32 to vector<3x1xf32>
      %110 = vector.broadcast %cst_103 : f32 to vector<3x1xf32>
      %111 = arith.select %108, %109, %110 : vector<3x1xi1>, vector<3x1xf32>
      %112 = arith.subf %103, %111 : vector<3x1xf32>
      %cst_104 = arith.constant 9.99999997E-7 : f32
      %113 = vector.broadcast %cst_104 : f32 to vector<3x1xf32>
      %114 = arith.addf %101, %113 : vector<3x1xf32>
      %115 = arith.addf %112, %105 : vector<3x1xf32>
      %cst_105 = arith.constant 9.99999997E-7 : f32
      %116 = vector.broadcast %cst_105 : f32 to vector<3x1xf32>
      %117 = arith.addf %115, %116 : vector<3x1xf32>
      %118 = arith.subf %117, %114 : vector<3x1xf32>
      %119 = arith.divf %114, %118 : vector<3x1xf32>
      %120 = vector.shape_cast %119 : vector<3x1xf32> to vector<1x3x1xf32>
      %cst_106 = arith.constant dense<0.000000e+00> : vector<1xf32>
      %121 = vector.multi_reduction <add>, %120, %cst_106 [1, 2] : vector<1x3x1xf32> to vector<1xf32>
      %122 = vector.shape_cast %121 : vector<1xf32> to vector<1x1x1xf32>
      %123 = vector.extract %122[0, 0, 0] : f32 from vector<1x1x1xf32>
      %124 = vector.broadcast %123 : f32 to vector<1x8x128xf32>
      %c0_107 = arith.constant 0 : index
      %c0_108 = arith.constant 0 : index
      %c0_109 = arith.constant 0 : index
      %125 = vector.load %arg4[%c0_107, %c0_108, %c0_109] : memref<1x8x128xf32, #tpu.memory_space<vmem>>, vector<1x8x128xf32>
      tpu.vector_store %arg4[%c0_107, %c0_108, %c0_109], %124 {strides = array<i32>} : memref<1x8x128xf32, #tpu.memory_space<vmem>>, vector<1x8x128xf32>,
    } else {
    }
    return
  }
  func.func @transform_0(%arg0: i32, %arg1: i32) -> (i32, i32, i32, i32) {
    %c0_i32 = arith.constant 0 : i32
    %c0_i32_0 = arith.constant 0 : i32
    %c0_i32_1 = arith.constant 0 : i32
    return %arg0, %c0_i32, %arg1, %c0_i32_0 : i32, i32, i32, i32
  }
  func.func @transform_1(%arg0: i32, %arg1: i32) -> (i32, i32, i32, i32) {
    %c0_i32 = arith.constant 0 : i32
    %c0_i32_0 = arith.constant 0 : i32
    %c0_i32_1 = arith.constant 0 : i32
    return %arg0, %c0_i32, %arg1, %c0_i32_0 : i32, i32, i32, i32
  }
  func.func @transform_2(%arg0: i32, %arg1: i32) -> (i32, i32, i32) {
    %c0_i32 = arith.constant 0 : i32
    %c0_i32_0 = arith.constant 0 : i32
    %c0_i32_1 = arith.constant 0 : i32
    return %arg0, %c0_i32, %c0_i32_0 : i32, i32, i32
  }
}

</mosaic_0001>

<bundles_post_ra>
// kernel: tpu_custom_call.1
= control target key start
LH: loop header
LB: loop body
LE: loop exit
PB: predicated region body
PF: predicated region fallthrough
CT: control target
= control target key end

     0   :  { %7 = vsyncpa [#allocation6], 0  ;;  %s1050_s0 = inlined_call_operand.hbm [shape: f32[2,3,8,128], index: 0, kind: input, shape index: {}]   ;;  %s1051_s1 = inlined_call_operand.hbm [shape: f32[2,3,8,128], index: 1, kind: input, shape index: {}]   ;;  %s1052_s2 = inlined_call_operand.hbm [shape: f32[2,8,128], index: 2, kind: output, shape index: {}]  }
   0x1   :  { %9 = vsyncpa [#allocation6 + $0x1], 0 }
   0x2   :  { %10 = vsyncpa [#allocation9], 0 }
   0x3   :  { %12 = vsyncpa [#allocation9 + $0x1], 0 }
   0x4   :  { %13 = vsyncpa [#allocation7], 0 }
   0x5   :  { %15 = vsyncpa [#allocation7 + $0x1], 0  ;;  %s815_s9 = smov 0   ;;  %s817_s10 = smov 0  }
   0x6   :  { %s819_s11 = smov 0   ;;  %s821_s12 = smov 0  }
   0x7   :  { %s823_s13 = smov 0   ;;  %s825_s14 = smov 0  }
   0x8 LB: > { %s546_s15 = sadd.s32 4294967295, %s791_s14   ;;  %s547_s16 = sadd.s32 4294967294, %s791_s14   ;;  %s791_s14 = sphi %s825_s14, %s21_s14   ;;  %s787_s13 = sphi %s823_s13, %s1070_s13   ;;  %s783_s12 = sphi %s821_s12, %s1069_s12   ;;  %s779_s11 = sphi %s819_s11, %s1068_s11   ;;  %s775_s10 = sphi %s817_s10, %s1067_s10   ;;  %s771_s9 = sphi %s815_s9, %s1066_s9  }
   0x9   : > { %s33_s17 = sadd.s32 1, %s787_s13  ;;  %s42_s18 = sadd.s32 1, %s779_s11 }
   0xa   : > { %p35_p0 = scmp.ge.s32.totalorder %s33_s17, 2  ;;  %p49_p1 = scmp.ne.s32.totalorder %s779_s11, %s775_s10 }
   0xb   : > { %p50_p2 = scmp.eq.s32.totalorder %s791_s14, 0  ;;  %p55_p3 = scmp.ne.s32.totalorder %s775_s10, %s771_s9 }
   0xc   : > { %s1072_s17 = smov (%p35_p0, %s33_s17), 0  ;;  %p56_p5 = scmp.eq.s32.totalorder %s546_s15, 0 }
   0xd   : > { %p856_p4 = por %p50_p2, %p49_p1  ;;  %s37_s20 = ssub.s32 %s787_s13, %s1072_s17 }
   0xe   : > { %p107_p6 = scmp.eq.s32.totalorder %s546_s15, 1  ;;  %p40_p7 = scmp.eq.s32.totalorder %s37_s20, 0 }
   0xf   : > { %p862_p8 = por %p56_p5, %p55_p3  ;;  %p113_p10 = scmp.eq.s32.totalorder %s547_s16, 1 }
  0x10   : > { %p866_p9 = por %p107_p6, %p49_p1  ;;  %p585_p13 = scmp.lt.s32.totalorder %s791_s14, 2 }
  0x11   : > { %s1056_s21 = scalar_select %p862_p8, 1, 0 }
  0x12   : > { %s1057_s22 = scalar_select %p866_p9, 1, 0 }
  0x13   : > { %s871_s23 = scalar_select %p40_p7, %s779_s11, %s42_s18  }
  0x14   : > { %p873_p11 = por %p113_p10, %p55_p3  ;;  %s880_s25 = sand.u32 1, %s779_s11  }
  0x15   : > { %s561_s26 = smul.u32 24, %s880_s25  ;;  %p886_p0 = pnand %p585_p13, %p856_p4 }
  0x16   : > { %s1058_s24 = scalar_select %p873_p11, 1, 0 }
  0x17   : > { %s562_s27 = smul.u32 384, %s787_s13  ;;  %s137_s4 = scalar_lea.vmem [#allocation5], %s561_s26 }
  0x18   : > { %s145_s5 = sshll.u32 %s137_s4, 4  ;;  %s134_s6 = scalar_lea.sflag [#allocation6], %s880_s25  ;;  %s899_s5 = int_to_ptr.vmem [resolvable:$true] %s145_s5 }
  0x19   : > { %s895_s3 = scalar_lea.hbm %s1050_s0, %s562_s27  ;;  %p647_p3 = pneg %p886_p0 }
  0x1a   : > { %s645_s7 = scalar_lea.hbm %s895_s3, 384  ;;  %s650_s16 = scalar_lea.hbm %s1050_s0, 768 }
  0x1b   : > { %p646_p2 = scmp.ne.s32.totalorder %s895_s3, %s645_s7  ;;  %p651_p6 = scmp.lt.u32.totalorder %s895_s3, %s1050_s0 }
  0x1c   : > { %p652_p7 = scmp.lt.u32.totalorder %s650_s16, %s645_s7  ;;  %p654_p13 = scmp.lt.u32.totalorder %s645_s7, %s895_s3 }
  0x1d   : > { %p648_p4 = pnand %p647_p3, %p646_p2 }
  0x1e   : > { %p653_p10 = por %p652_p7, %p651_p6 }
  0x1f   : > { %p649_p5 = pneg %p648_p4 }
  0x20   : > { %p655_p12 = por %p654_p13, %p653_p10 }
  0x22   : > { %p656_p1 = pnand %p655_p12, %p649_p5 }
  0x24   : > { %659 = shalt.err (!%p656_p1)
}
  0x25   : > { %s660_s20 = scalar_lea.vmem %s899_s5, 384  ;;  %s793_s29 = smov [#allocation5]  }
  0x26   : > { %p661_p2 = scmp.ne.s32.totalorder %s899_s5, %s660_s20  ;;  %s665_s30 = sshll.u32 %s793_s29, 4  ;;  %s666_s30 = int_to_ptr.vmem [resolvable:$false] %s665_s30 }
  0x27   : > { %s667_s4 = scalar_lea.vmem %s666_s30, 768  ;;  %p668_p9 = scmp.lt.s32.totalorder %s899_s5, %s666_s30 }
  0x28   : > { %p663_p4 = pnand %p661_p2, %p647_p3  ;;  %p669_p6 = scmp.lt.s32.totalorder %s667_s4, %s660_s20 }
  0x2a   : > { %p664_p11 = pneg %p663_p4  ;;  %p670_p7 = por %p669_p6, %p668_p9 }
  0x2c   : > { %p671_p10 = pnand %p670_p7, %p664_p11 }
  0x2e   : > { %674 = shalt.err (!%p671_p10)
}
  0x2f   : > { %s794_s7 = smov 128   ;;  %s795_s8 = smov 8  }
  0x30   : > { %577 = dma.hbm_to_vmem [thread:$0]  (!%p886_p0), %s895_s3, 384, %s899_s5, %s134_s6, %s794_s7, %s794_s7, %s795_s8  }
  0x31   : > { %p175_p9 = scmp.lt.s32.totalorder %s791_s14, 3  ;;  %s939_s18 = scalar_lea.hbm %s1051_s1, %s562_s27 }
  0x32   : > { %p1060_p11 = scmp.ge.s32.totalorder %s791_s14, 1  ;;  %s159_s20 = scalar_lea.vmem [#allocation8], %s561_s26 }
  0x33   : > { %s167_s29 = sshll.u32 %s159_s20, 4  ;;  %s156_s3 = scalar_lea.sflag [#allocation9], %s880_s25  ;;  %s949_s29 = int_to_ptr.vmem [resolvable:$true] %s167_s29 }
  0x34   : > { %p943_p12 = pnand %p1060_p11, %p175_p9  ;;  %s675_s5 = scalar_lea.hbm %s939_s18, 384 }
  0x35   : > { %p676_p1 = scmp.ne.s32.totalorder %s939_s18, %s675_s5  ;;  %s680_s30 = scalar_lea.hbm %s1051_s1, 768 }
  0x36   : > { %p681_p2 = scmp.lt.u32.totalorder %s939_s18, %s1051_s1  ;;  %p682_p4 = scmp.lt.u32.totalorder %s680_s30, %s675_s5 }
  0x37   : > { %p678_p5 = pnand %p676_p1, %p647_p3  ;;  %p684_p7 = scmp.lt.u32.totalorder %s675_s5, %s939_s18 }
  0x38   : > { %p683_p6 = por %p682_p4, %p681_p2 }
  0x39   : > { %p679_p13 = pneg %p678_p5 }
  0x3a   : > { %p685_p10 = por %p684_p7, %p683_p6 }
  0x3c   : > { %p686_p9 = pnand %p685_p10, %p679_p13 }
  0x3e   : > { %689 = shalt.err (!%p686_p9)
}
  0x3f   : > { %s690_s26 = scalar_lea.vmem %s949_s29, 384  ;;  %s796_s16 = smov [#allocation8]  }
  0x40   : > { %p691_p11 = scmp.ne.s32.totalorder %s949_s29, %s690_s26  ;;  %s695_s20 = sshll.u32 %s796_s16, 4  ;;  %s696_s20 = int_to_ptr.vmem [resolvable:$false] %s695_s20 }
  0x41   : > { %s697_s27 = scalar_lea.vmem %s696_s20, 768  ;;  %p698_p8 = scmp.lt.s32.totalorder %s949_s29, %s696_s20 }
  0x42   : > { %p693_p1 = pnand %p691_p11, %p647_p3  ;;  %p699_p2 = scmp.lt.s32.totalorder %s697_s27, %s690_s26 }
  0x44   : > { %p694_p5 = pneg %p693_p1  ;;  %p700_p4 = por %p699_p2, %p698_p8 }
  0x46   : > { %p701_p6 = pnand %p700_p4, %p694_p5 }
  0x48   : > { %704 = shalt.err (!%p701_p6)
}
  0x49   : > { %580 = dma.hbm_to_vmem [thread:$0]  (!%p886_p0), %s939_s18, 384, %s949_s29, %s156_s3, %s794_s7, %s794_s7, %s795_s8  }
  0x4a   : > { %179 = sbr.rel (%p943_p12) target bundleno = 498 (0x1f2), region = 28  ;;  %s983_s5 = sand.u32 (!%p943_p12), 1, %s775_s10  }
  0x4b   : > { %s565_s6 = smul.u32 (!%p943_p12), 24, %s983_s5  ;;  %s182_s30 = scalar_lea.sflag (!%p943_p12), [#allocation6], %s983_s5 }
  0x4c   : > { %p1062_p8 = scmp.ne.s32.totalorder (!%p943_p12), %s1056_s21, 0 }
  0x4d   : > { %s185_s28 = scalar_lea.vmem (!%p943_p12), [#allocation5], %s565_s6 }
  0x51   : > { %758 = dma.done.wait (%p1062_p8), %s182_s30, 384  }
  0x52   : > { %760 = vsyncadd (%p1062_p8), %s182_s30, 4294966912  ;;  %s191_s25 = scalar_lea.sflag [#allocation9], %s983_s5  ;;  %s194_s7 = scalar_lea.vmem [#allocation8], %s565_s6 }
  0x53   : > { %762 = dma.done.wait (%p1062_p8), %s191_s25, 384  }
  0x54   : > { %764 = vsyncadd (%p1062_p8), %s191_s25, 4294966912  ;;  %v238_v0 = vld [vmem:[%s194_s7 + $0x10] sm:$0xff]  ;;  %v237_v1 = vld [vmem:[%s194_s7 + $0x8] sm:$0xff]  ;;  %v797_v6 = vmov 0   ;;  %v798_v9 = vmov 0.0   ;;  %v373_v17 = vlaneseq  ;;  %vm408_vm6 = vcmask 1041409  }
  0x55   : > { %v233_v2 = vld [vmem:[%s185_s28] sm:$0xff]  ;;  %365 = vadd.xlane.f32.xlu0 %v238_v0  ;;  %357 = vadd.xlane.f32.xlu1 %v237_v1  ;;  %v234_v3 = vld [vmem:[%s185_s28 + $0x8] sm:$0xff]  ;;  %v235_v4 = vld [vmem:[%s185_s28 + $0x10] sm:$0xff]  ;;  %vm411_vm7 = vcmask 1042434   ;;  %vm414_vm8 = vcmask 2048   ;;  %s553_s21 = sshll.u32 %s983_s5, 3 }
  0x56   : > { %vm239_vm0 = vcmp.gt.f32.partialorder %v234_v3, %v233_v2  ;;  %v236_v14 = vld [vmem:[%s194_s7] sm:$0xff]  ;;  %v374_v23 = vshrl.u32 %v373_v17, 7  ;;  %s219_s8 = scalar_lea.vmem [#allocation10], %s553_s21  ;;  %s558_s19 = sshll.u32 %s783_s12, 7 }
  0x57   : > { %v240_v5 = vsel %vm239_vm0, %v234_v3, %v233_v2  ;;  %v241_v7 = vsel %vm239_vm0, 1, %v797_v6  ;;  %s441_s18 = sshll.u32 %s219_s8, 4  ;;  %s1003_s15 = scalar_lea.hbm %s1052_s2, %s558_s19  ;;  %s998_s18 = int_to_ptr.vmem [resolvable:$true] %s441_s18 }
  0x58   : > { %vm242_vm1 = vcmp.gt.f32.partialorder %v235_v4, %v240_v5  ;;  %vm375_vm5 = vcmp.eq.s32.totalorder %v374_v23, 0  ;;  %s428_s26 = scalar_lea.sflag [#allocation7], %s983_s5  ;;  %s705_s16 = scalar_lea.vmem %s998_s18, 128 }
  0x59   : > { %v243_v8 = vsel %vm242_vm1, 2, %v241_v7  ;;  %v376_v32 = vsel %vm375_vm5, 768.0, %v798_v9  ;;  %p706_p0 = scmp.ne.s32.totalorder %s998_s18, %s705_s16  ;;  %p1063_p3 = scmp.ne.s32.totalorder %s1057_s22, 0 }
  0x5a   : > { %vm257_vm2 = vcmp.eq.s32.totalorder %v243_v8, 1  ;;  %vm244_vm3 = vcmp.eq.s32.totalorder %v243_v8, 0  ;;  %vm273_vm4 = vcmp.eq.s32.totalorder %v243_v8, 2  ;;  %v378_v46 = vrot.slane %v376_v32, 1  ;;  %s799_s12 = smov [#allocation10]  }
  0x5b   : > { %v555_v10 = vsel %vm257_vm2, 1.0, %v798_v9  ;;  %v554_v11 = vsel %vm244_vm3, 1.0, %v798_v9  ;;  %v556_v12 = vsel %vm273_vm4, 1.0, %v798_v9  ;;  %v260_v13 = vsel %vm257_vm2, %v237_v1, 0.0  ;;  %p707_p12 = pnand %p706_p0, %p1063_p3  ;;  %s709_s20 = sshll.u32 %s799_s12, 4  ;;  %s710_s20 = int_to_ptr.vmem [resolvable:$false] %s709_s20 }
  0x5c   : > { %330 = vadd.xlane.f32.xlu0 %v555_v10  ;;  %322 = vadd.xlane.f32.xlu1 %v554_v11  ;;  %v276_v15 = vsel %vm273_vm4, %v238_v0, 0.0  ;;  %v246_v16 = vsel %vm244_vm3, %v236_v14, 0.0  ;;  %v379_v60 = vrot.slane %v376_v32, 2  ;;  %s711_s27 = scalar_lea.vmem %s710_s20, 256  ;;  %p712_p7 = scmp.lt.s32.totalorder %s998_s18, %s710_s20 }
  0x5d   : > { %p708_p13 = pneg %p707_p12  ;;  %p713_p10 = scmp.lt.s32.totalorder %s711_s27, %s705_s16 }
  0x5f   : > { %p714_p9 = por %p713_p10, %p712_p7 }
  0x60   : > { %338 = vadd.xlane.f32.xlu0 %v556_v12  ;;  %303 = vadd.xlane.f32.xlu1 %v260_v13 }
  0x61   : > { %p715_p11 = pnand %p714_p9, %p708_p13 }
  0x64   : > { %349 = vadd.xlane.f32.xlu0 %v236_v14  ;;  %311 = vadd.xlane.f32.xlu1 %v276_v15 }
  0x68   : > { %295 = vadd.xlane.f32.xlu0 %v246_v16 }
  0xe2   : > { %v366_v18 = vpop.xlane.xlu0 %365  ;;  %v358_v19 = vpop.xlane.xlu1 %357 }
  0xe3   : > { %v359_v20 = vrot.slane %v358_v19, 4  ;;  %v367_v21 = vrot.slane %v366_v18, 4 }
  0xe5   : > { %v360_v22 = vadd.f32 %v359_v20, %v358_v19  ;;  %v368_v24 = vadd.f32 %v367_v21, %v366_v18 }
  0xe7   : > { %v361_v25 = vrot.slane %v360_v22, 2  ;;  %v369_v33 = vrot.slane %v368_v24, 2 }
  0xe9   : > { %v331_v26 = vpop.xlane.xlu0 %330  ;;  %v323_v27 = vpop.xlane.xlu1 %322  ;;  %v362_v34 = vadd.f32 %v361_v25, %v360_v22  ;;  %v370_v45 = vadd.f32 %v369_v33, %v368_v24 }
  0xea   : > { %v332_v28 = vrot.slane %v331_v26, 4  ;;  %v324_v29 = vrot.slane %v323_v27, 4 }
  0xeb   : > { %v363_v49 = vrot.slane %v362_v34, 1  ;;  %v371_v59 = vrot.slane %v370_v45, 1 }
  0xec   : > { %v333_v30 = vadd.f32 %v332_v28, %v331_v26  ;;  %v325_v31 = vadd.f32 %v324_v29, %v323_v27 }
  0xed   : > { %v339_v35 = vpop.xlane.xlu0 %338  ;;  %v304_v36 = vpop.xlane.xlu1 %303  ;;  %v364_v0 = vadd.f32 %v363_v49, %v362_v34  ;;  %v372_v14 = vadd.f32 %v371_v59, %v370_v45 }
  0xee   : > { %v334_v37 = vrot.slane %v333_v30, 2  ;;  %v326_v38 = vrot.slane %v325_v31, 2  ;;  %v340_v39 = vrot.slane %v339_v35, 4  ;;  %v305_v40 = vrot.slane %v304_v36, 4 }
  0xf0   : > { %v335_v41 = vadd.f32 %v334_v37, %v333_v30  ;;  %v327_v42 = vadd.f32 %v326_v38, %v325_v31  ;;  %v341_v43 = vadd.f32 %v340_v39, %v339_v35  ;;  %v306_v44 = vadd.f32 %v305_v40, %v304_v36 }
  0xf1   : > { %v350_v47 = vpop.xlane.xlu0 %349  ;;  %v312_v48 = vpop.xlane.xlu1 %311 }
  0xf2   : > { %v336_v50 = vrot.slane %v335_v41, 1  ;;  %v342_v51 = vrot.slane %v341_v43, 2  ;;  %v307_v52 = vrot.slane %v306_v44, 2  ;;  %v351_v53 = vrot.slane %v350_v47, 4 }
  0xf3   : > { %v313_v54 = vrot.slane %v312_v48, 4  ;;  %v328_v56 = vrot.slane %v327_v42, 1 }
  0xf4   : > { %v337_v55 = vadd.f32 %v336_v50, %v335_v41  ;;  %v343_v57 = vadd.f32 %v342_v51, %v341_v43  ;;  %v308_v58 = vadd.f32 %v307_v52, %v306_v44  ;;  %v352_v61 = vadd.f32 %v351_v53, %v350_v47 }
  0xf5   : > { %v314_v62 = vadd.f32 %v313_v54, %v312_v48  ;;  %v296_v63 = vpop.xlane.xlu0 %295  ;;  %v329_v8 = vadd.f32 %v328_v56, %v327_v42 }
  0xf6   : > { %v384_v1 = vsub.f32 %v337_v55, %v378_v46  ;;  %v344_v2 = vrot.slane %v343_v57, 1  ;;  %v309_v3 = vrot.slane %v308_v58, 1  ;;  %v353_v4 = vrot.slane %v352_v61, 2 }
  0xf7   : > { %v315_v5 = vrot.slane %v314_v62, 2  ;;  %v297_v6 = vrot.slane %v296_v63, 4  ;;  %v383_v21 = vsub.f32 %v329_v8, %v376_v32 }
  0xf8   : > { %v390_v7 = vadd.f32 %v384_v1, %v364_v0  ;;  %v345_v9 = vadd.f32 %v344_v2, %v343_v57  ;;  %v310_v10 = vadd.f32 %v309_v3, %v308_v58  ;;  %v354_v11 = vadd.f32 %v353_v4, %v352_v61 }
  0xf9   : > { %v316_v12 = vadd.f32 %v315_v5, %v314_v62  ;;  %v298_v13 = vadd.f32 %v297_v6, %v296_v63 }
  0xfa   : > { %v385_v15 = vsub.f32 %v345_v9, %v379_v60  ;;  %v393_v16 = vadd.f32 1e-06, %v390_v7  ;;  %v387_v17 = vadd.f32 1e-06, %v310_v10  ;;  %v355_v18 = vrot.slane %v354_v11, 1 }
  0xfb   : > { %v317_v19 = vrot.slane %v316_v12, 1  ;;  %v299_v20 = vrot.slane %v298_v13, 2 }
  0xfc   : > { %v391_v22 = vadd.f32 %v385_v15, %v372_v14  ;;  %v396_v23 = vsub.f32 %v393_v16, %v387_v17  ;;  %v356_v24 = vadd.f32 %v355_v18, %v354_v11 }
  0xfd   : > { %v318_v25 = vadd.f32 %v317_v19, %v316_v12  ;;  %v300_v26 = vadd.f32 %v299_v20, %v298_v13 }
  0xfe   : > { %v394_v27 = vadd.f32 1e-06, %v391_v22  ;;  %v389_v28 = vadd.f32 %v383_v21, %v356_v24  ;;  %639 = vrcp.f32 %v396_v23 }
  0xff   : > { %v388_v29 = vadd.f32 1e-06, %v318_v25  ;;  %v301_v30 = vrot.slane %v300_v26, 1 }
 0x100   : > { %v392_v34 = vadd.f32 1e-06, %v389_v28 }
 0x101   : > { %v397_v31 = vsub.f32 %v394_v27, %v388_v29  ;;  %v302_v33 = vadd.f32 %v301_v30, %v300_v26 }
 0x103   : > { %641 = vrcp.f32 %v397_v31  ;;  %v386_v35 = vadd.f32 1e-06, %v302_v33 }
 0x105   : > { %v395_v36 = vsub.f32 %v392_v34, %v386_v35 }
 0x107   : > { %643 = vrcp.f32 %v395_v36 }
 0x108   : > { %v640_v37 = vpop.eup %639 }
 0x109   : > { %v401_v32 = vmul.f32 %v640_v37, %v387_v17 }
 0x10b   : > { %v407_v42 = vrot.slane %v401_v32, 7 }
 0x10d   : > { %v642_v38 = vpop.eup %641 }
 0x10e   : > { %v403_v39 = vmul.f32 %v642_v38, %v388_v29 }
 0x110   : > { %v410_v43 = vrot.slane %v403_v39, 6 }
 0x111   : > { %v644_v40 = vpop.eup %643 }
 0x112   : > { %v399_v41 = vmul.f32 %v644_v40, %v386_v35 }
 0x114   : > { %v409_v44 = vsel %vm408_vm6, %v407_v42, %v399_v41 }
 0x115   : > { %v412_v45 = vsel %vm411_vm7, %v410_v43, %v409_v44 }
 0x116   : > { %v415_v46 = vsel %vm414_vm8, %v412_v45, 0.0 }
 0x117   : > { %416 = vadd.xlane.f32.xlu1 %v415_v46 }
 0x1a4   : > { %v417_v47 = vpop.xlane.xlu1 %416 }
 0x1a5   : > { %v418_v48 = vrot.slane %v417_v47, 4 }
 0x1a7   : > { %v419_v49 = vadd.f32 %v418_v48, %v417_v47 }
 0x1a9   : > { %v420_v50 = vrot.slane %v419_v49, 2 }
 0x1ab   : > { %v421_v51 = vadd.f32 %v420_v50, %v419_v49 }
 0x1ad   : > { %v422_v52 = vrot.slane %v421_v51, 1 }
 0x1af   : > { %v423_v53 = vadd.f32 %v422_v52, %v421_v51 }
 0x1b1   : > { %566 = vpush %v423_v53 }
 0x1e2   : > { %s567_s29 = spop %566 }
 0x1e3   : > { %v425_v54 = vstv %s567_s29 }
 0x1e4   : > { %426 = vst [vmem:[%s219_s8] sm:$0xff] %v425_v54 }
 0x1e5   : > { %718 = shalt.err (!%p715_p11)
}
 0x1e6   : > { %s719_s5 = scalar_lea.hbm %s1003_s15, 128  ;;  %s723_s28 = scalar_lea.hbm %s1052_s2, 256 }
 0x1e7   : > { %p720_p1 = scmp.ne.s32.totalorder %s1003_s15, %s719_s5  ;;  %p724_p4 = scmp.lt.u32.totalorder %s1003_s15, %s1052_s2 }
 0x1e8   : > { %p725_p6 = scmp.lt.u32.totalorder %s723_s28, %s719_s5  ;;  %p727_p0 = scmp.lt.u32.totalorder %s719_s5, %s1003_s15 }
 0x1e9   : > { %p721_p5 = pnand %p720_p1, %p1063_p3 }
 0x1ea   : > { %p726_p8 = por %p725_p6, %p724_p4 }
 0x1eb   : > { %p722_p2 = pneg %p721_p5 }
 0x1ec   : > { %p728_p12 = por %p727_p0, %p726_p8 }
 0x1ee   : > { %p729_p13 = pnand %p728_p12, %p722_p2 }
 0x1f0   : > { %732 = shalt.err (!%p729_p13)
}
 0x1f1   : > { %572 = dma.vmem_to_hbm [thread:$0]  (%p1063_p3), %s998_s18, 128, %s1003_s15, %s428_s26  }
 0x1f2 PF: > { %s453_s21 = sand.u32 1, %s771_s9   ;;  %p1064_p7 = scmp.ne.s32.totalorder %s1058_s24, 0 }
 0x1f3   : > { %p1065_p10 = scmp.ge.s32.totalorder %s791_s14, 2  ;;  %s454_s8 = scalar_lea.sflag [#allocation7], %s453_s21 }
 0x1f5   : > { %p582_p9 = pnand %p1065_p10, %p1064_p7 }
 0x1f7   : > { %766 = dma.done.wait (!%p582_p9), %s454_s8, 128  }
 0x1f8   : > { %768 = vsyncadd (!%p582_p9), %s454_s8, 4294967168  ;;  %s21_s14 = sadd.s32 1, %s791_s14   ;;  %s1066_s9 = smov %s775_s10 }
 0x1f9   : > { %p18_p11 = scmp.ge.s32.totalorder %s21_s14, 4   ;;  %s1067_s10 = smov %s779_s11 }
 0x1fa   : > { %s1068_s11 = smov %s871_s23  ;;  %s1069_s12 = smov %s787_s13 }
 0x1fb   : > { %s1070_s13 = smov %s1072_s17  ;;  %20 = sbr.rel (!%p18_p11) target bundleno = 8 (0x8), region = 100 }
 0x202   :  { %459 = vsyncpa [#allocation6], 1 }
 0x203   :  { %461 = vsyncpa [#allocation6 + $0x1], 1 }
 0x204   :  { %462 = vsyncpa [#allocation9], 1 }
 0x205   :  { %464 = vsyncpa [#allocation9 + $0x1], 1 }
 0x206   :  { %465 = vsyncpa [#allocation7], 1 }
 0x207   :  { %467 = vsyncpa [#allocation7 + $0x1], 1 }

</bundles_post_ra>
